<compile_context>
chip_gen: v6e
topology: v6e:2x2x1
jax: 0.10.0
libtpu: 0.0.40
codegen_flags: <defaults>
</compile_context>

<pallas_src>
import jax
import jax.numpy as jnp
from jax.experimental import pallas as pl
from jax.experimental.pallas import tpu as pltpu


def _qonly_bow_kernel(qf_ref, wf_ref, b_ref, o_ref):
    q = qf_ref[...]                      # (N, 1) int32, N = B*S
    N = q.shape[0]
    V = wf_ref.shape[0]
    B = o_ref.shape[0]
    S = N // B

    # Lane-dense one-hot over the vocab (lane = V, sublane = token).
    # 0/1 values are exact in bf16; halves the vreg footprint of the (N, V) tile.
    lane_v = jax.lax.broadcasted_iota(jnp.int32, (N, V), 1)
    onehot = (lane_v == q).astype(jnp.bfloat16)            # (N, V)

    # Per-batch bag-of-words counts via a layout-preserving reshape + sublane
    # reduce (XLU).  With S == 8 each batch row occupies exactly one (8, 128)
    # sublane tile, so this is a pure in-tile reduction — no pool matmul, no
    # MXU->MXU serial dependency.  Counts <= S, so the bf16 sum is exact.
    counts = onehot.reshape(B, S, V).sum(axis=1)           # (B, V) bf16

    # Single fused matmul (K = V = 128): counts @ (embed @ W_lin^T) + bias.
    # W_fused stays f32 for exactness; counts are small exact integers.
    # NOTE: the reference's torch.div(q_embed_average[i], q_lens[i]) discards
    # its result, so no division is applied here either (sum, not average).
    o_ref[...] = (
        jnp.dot(counts.astype(jnp.float32), wf_ref[...],
                preferred_element_type=jnp.float32)
        + b_ref[...]
    )


def fuse_qonly_bow_params(embed_w, lin_w, lin_b):
    """Init-time / parameter-update-time fusion (hoisted out of the forward).

    embed_w: (V, E) f32, lin_w: (C, E) f32, lin_b: (C,) f32
      -> w_fused: (V, C) f32 = embed_w @ lin_w.T,  b2: (1, C) f32.

    Call this once and cache the result; re-call only when weights change.
    """
    C = lin_w.shape[0]
    w_fused = jnp.dot(embed_w.astype(jnp.float32), lin_w.T.astype(jnp.float32))
    b2 = lin_b.reshape(1, C).astype(jnp.float32)
    return w_fused, b2


def qonly_bow_forward(q_input, q_lens, w_fused, b2):
    """q_input: (B, S) int, q_lens: (B,) int (unused: reference div is a no-op),
    w_fused: (V, C) f32 cached from fuse_qonly_bow_params, b2: (1, C) f32
      -> (B, C) f32."""
    del q_lens  # the reference's division is a discarded no-op
    B, S = q_input.shape
    V, C = w_fused.shape
    q_flat = q_input.reshape(B * S, 1).astype(jnp.int32)

    return pl.pallas_call(
        _qonly_bow_kernel,
        out_shape=jax.ShapeDtypeStruct((B, C), jnp.float32),
        grid=(1,),
        in_specs=[
            pl.BlockSpec((B * S, 1), lambda i: (0, 0)),   # token ids
            pl.BlockSpec((V, C), lambda i: (0, 0)),       # fused (V, C) table
            pl.BlockSpec((1, C), lambda i: (0, 0)),       # bias
        ],
        out_specs=pl.BlockSpec((B, C), lambda i: (0, 0)),
        compiler_params=pltpu.CompilerParams(
            dimension_semantics=("arbitrary",),
        ),
    )(q_flat, w_fused, b2)


if __name__ == "__main__":
    # Shapes consistent with the module's constructor:
    # batch_size=4, seq=8, vocab_size=128, embedding_size=32, nb_classes=16.
    B, S, V, E, C = 4, 8, 128, 32, 16

    key = jax.random.PRNGKey(0)
    k_emb, k_lin, k_q, k_len = jax.random.split(key, 4)

    # nn.Embedding default init: N(0,1); padding_idx=0 row zeroed.
    embed_w = jax.random.normal(k_emb, (V, E), dtype=jnp.float32)
    embed_w = embed_w.at[0].set(0.0)

    # nn.Linear: xavier_uniform_ weight, bias filled with 0.0 (weights_init).
    bound = (6.0 / (E + C)) ** 0.5
    lin_w = jax.random.uniform(k_lin, (C, E), dtype=jnp.float32,
                               minval=-bound, maxval=bound)
    lin_b = jnp.zeros((C,), dtype=jnp.float32)

    q_input = jax.random.randint(k_q, (B, S), 0, V, dtype=jnp.int32)
    q_lens = jax.random.randint(k_len, (B,), 1, S + 1, dtype=jnp.int32)

    # Fuse once (init-time), then run the forward with the cached fused params.
    w_fused, b2 = fuse_qonly_bow_params(embed_w, lin_w, lin_b)
    w_fused, b2 = jax.block_until_ready((w_fused, b2))

    out = qonly_bow_forward(q_input, q_lens, w_fused, b2)
    out = jax.block_until_ready(out)

    # Plain-JAX reference (same semantics: sum over sequence, no division).
    ref = jnp.sum(embed_w[q_input], axis=1) @ lin_w.T + lin_b
    assert out.shape == (B, C)
    assert jnp.allclose(out, ref, atol=1e-4, rtol=1e-4), "mismatch vs reference"

    print("KERNEL_OK")
</pallas_src>

<mosaic_0001>
module attributes {stable_mosaic.version = 11 : i64} {
  func.func @_qonly_bow_kernel(%arg0: i32, %arg1: memref<32x1xi32, #tpu.memory_space<vmem>>, %arg2: memref<128x16xf32, #tpu.memory_space<vmem>>, %arg3: memref<1x16xf32, #tpu.memory_space<vmem>>, %arg4: memref<4x16xf32, #tpu.memory_space<vmem>>) attributes {dimension_semantics = [#tpu.dimension_semantics<arbitrary>], iteration_bounds = array<i64: 1>, scalar_prefetch = 0 : i64, scratch_operands = 0 : i64, tpu.core_type = #tpu.core_type<tc>, window_params = [{pipeline_mode = #tpu.pipeline_mode<synchronous>, transform_indices = @transform_0, window_bounds = array<i64: 32, 1>}, {pipeline_mode = #tpu.pipeline_mode<synchronous>, transform_indices = @transform_1, window_bounds = array<i64: 128, 16>}, {pipeline_mode = #tpu.pipeline_mode<synchronous>, transform_indices = @transform_2, window_bounds = array<i64: 1, 16>}, {pipeline_mode = #tpu.pipeline_mode<synchronous>, transform_indices = @transform_3, window_bounds = array<i64: 4, 16>}]} {
    %c0 = arith.constant 0 : index
    %c0_0 = arith.constant 0 : index
    %0 = vector.load %arg1[%c0, %c0_0] : memref<32x1xi32, #tpu.memory_space<vmem>>, vector<32x1xi32>
    %1 = tpu.iota {dimensions = array<i32: 1>} : vector<32x128xi32>
    %2 = vector.broadcast %0 : vector<32x1xi32> to vector<32x128xi32>
    %3 = arith.cmpi eq, %1, %2 : vector<32x128xi32>
    %4 = arith.extui %3 : vector<32x128xi1> to vector<32x128xi32>
    %5 = arith.sitofp %4 : vector<32x128xi32> to vector<32x128xf32>
    %6 = arith.truncf %5 : vector<32x128xf32> to vector<32x128xbf16>
    %7 = vector.shape_cast %6 : vector<32x128xbf16> to vector<4x8x128xbf16>
    %8 = arith.extf %7 : vector<4x8x128xbf16> to vector<4x8x128xf32>
    %cst = arith.constant dense<0.000000e+00> : vector<4x128xf32>
    %9 = vector.multi_reduction <add>, %8, %cst [1] : vector<4x8x128xf32> to vector<4x128xf32>
    %10 = arith.truncf %9 : vector<4x128xf32> to vector<4x128xbf16>
    %11 = arith.extf %10 : vector<4x128xbf16> to vector<4x128xf32>
    %c0_1 = arith.constant 0 : index
    %c0_2 = arith.constant 0 : index
    %12 = vector.load %arg2[%c0_1, %c0_2] : memref<128x16xf32, #tpu.memory_space<vmem>>, vector<128x16xf32>
    %cst_3 = arith.constant dense<0.000000e+00> : vector<4x16xf32>
    %13 = tpu.matmul %11, %12, %cst_3 {dimension_numbers = #tpu.dot_dimension_numbers<[1], [0], [0], [1], [0, 0, 1, 1], [], []>} : vector<4x128xf32>, vector<128x16xf32>, vector<4x16xf32> -> vector<4x16xf32>
    %c0_4 = arith.constant 0 : index
    %c0_5 = arith.constant 0 : index
    %14 = vector.load %arg3[%c0_4, %c0_5] : memref<1x16xf32, #tpu.memory_space<vmem>>, vector<1x16xf32>
    %15 = vector.broadcast %14 : vector<1x16xf32> to vector<4x16xf32>
    %16 = arith.addf %13, %15 : vector<4x16xf32>
    %c0_6 = arith.constant 0 : index
    %c0_7 = arith.constant 0 : index
    %17 = vector.load %arg4[%c0_6, %c0_7] : memref<4x16xf32, #tpu.memory_space<vmem>>, vector<4x16xf32>
    tpu.vector_store %arg4[%c0_6, %c0_7], %16 {strides = array<i32>} : memref<4x16xf32, #tpu.memory_space<vmem>>, vector<4x16xf32>,
    return
  }
  func.func @transform_0(%arg0: i32) -> (i32, i32) {
    %c0_i32 = arith.constant 0 : i32
    %c0_i32_0 = arith.constant 0 : i32
    %c0_i32_1 = arith.constant 0 : i32
    return %c0_i32, %c0_i32_0 : i32, i32
  }
  func.func @transform_1(%arg0: i32) -> (i32, i32) {
    %c0_i32 = arith.constant 0 : i32
    %c0_i32_0 = arith.constant 0 : i32
    %c0_i32_1 = arith.constant 0 : i32
    return %c0_i32, %c0_i32_0 : i32, i32
  }
  func.func @transform_2(%arg0: i32) -> (i32, i32) {
    %c0_i32 = arith.constant 0 : i32
    %c0_i32_0 = arith.constant 0 : i32
    %c0_i32_1 = arith.constant 0 : i32
    return %c0_i32, %c0_i32_0 : i32, i32
  }
  func.func @transform_3(%arg0: i32) -> (i32, i32) {
    %c0_i32 = arith.constant 0 : i32
    %c0_i32_0 = arith.constant 0 : i32
    %c0_i32_1 = arith.constant 0 : i32
    return %c0_i32, %c0_i32_0 : i32, i32
  }
}

</mosaic_0001>

<bundles_post_ra>
// kernel: tpu_custom_call.1
= control target key start
LH: loop header
LB: loop body
LE: loop exit
PB: predicated region body
PF: predicated region fallthrough
CT: control target
= control target key end

     0   :  { %v310_v2 = vmov 0   ;;  %v311_v6 = vmov 0.0   ;;  %s421_s0 = inlined_call_operand.vmem [shape: s32[32,1], index: 0, kind: input, shape index: {}]   ;;  %s422_s1 = inlined_call_operand.vmem [shape: f32[128,16], index: 1, kind: input, shape index: {}]   ;;  %s423_s2 = inlined_call_operand.vmem [shape: f32[1,16], index: 2, kind: input, shape index: {}]   ;;  %s424_s3 = inlined_call_operand.hbm [shape: f32[4,16], index: 3, kind: output, shape index: {}]  }
   0x1   :  { %v17_v0 = vld [vmem:[%s421_s0 + $0x10] sm:$0xff]  ;;  %v15_v1 = vld [vmem:[%s421_s0] sm:$0xff]  ;;  %287 = vset.pattern.permute.xlu1 %v310_v2  ;;  %286 = vset.pattern.permute.xlu0 %v310_v2  ;;  %v112_v3 = vld [vmem:[%s422_s1 + $0x78] sm:$0xff] }
   0x2   :  { %28 = vperm.xlu1 %287, %v17_v0   ;;  %22 = vperm.xlu0 %286, %v15_v1   ;;  %v18_v4 = vld [vmem:[%s421_s0 + $0x18] sm:$0xff]  ;;  %v16_v5 = vld [vmem:[%s421_s0 + $0x8] sm:$0xff]  ;;  %v111_v7 = vld [vmem:[%s422_s1 + $0x70] sm:$0xff] }
   0x3   :  { %247 = vmatprep.subr.mxu0 %v311_v6 }
   0x4   :  { %248 = vmatpush3.msra.mxu0 %v112_v3 }
   0x5   :  { %8 = vsyncpa [#allocation3], 0  ;;  %249 = vmatprep.subr.mxu0 %v311_v6  ;;  %v110_v8 = vld [vmem:[%s422_s1 + $0x68] sm:$0xff]  ;;  %v109_v9 = vld [vmem:[%s422_s1 + $0x60] sm:$0xff]  ;;  %vm312_vm0 = vmmov 0   ;;  %v19_v22 = vlaneseq  ;;  %vm124_vm5 = vcmask 1041409  }
   0x6   :  { %31 = vperm.xlu1 %287, %v18_v4   ;;  %25 = vperm.xlu0 %286, %v16_v5   ;;  %v108_v10 = vld [vmem:[%s422_s1 + $0x58] sm:$0xff]  ;;  %v107_v11 = vld [vmem:[%s422_s1 + $0x50] sm:$0xff]  ;;  %v106_v12 = vld [vmem:[%s422_s1 + $0x48] sm:$0xff]  ;;  %vm126_vm6 = vcmask 1042434   ;;  %vm128_vm7 = vcmask 1043459   ;;  %s313_s25 = smov [#allocation2]  }
   0x7   :  { %250 = vmatpush3.msra.mxu0 %v111_v7  ;;  %279 = vmatprep.mubr.msk.f32.mxu0 %vm312_vm0, %v311_v6  ;;  %v105_v13 = vld [vmem:[%s422_s1 + $0x40] sm:$0xff]  ;;  %v104_v14 = vld [vmem:[%s422_s1 + $0x38] sm:$0xff]  ;;  %v103_v15 = vld [vmem:[%s422_s1 + $0x30] sm:$0xff]  ;;  %v20_v23 = vand.u32 127, %v19_v22  ;;  %s209_s0 = sshll.u32 %s313_s25, 4  ;;  %vm201_vm8 = vcmask 125952   ;;  %s210_s0 = int_to_ptr.vmem [resolvable:$true] %s209_s0 }
   0x8   :  { %251 = vmatprep.subr.mxu0 %v311_v6  ;;  %v102_v16 = vld [vmem:[%s422_s1 + $0x28] sm:$0xff]  ;;  %v101_v17 = vld [vmem:[%s422_s1 + $0x20] sm:$0xff]  ;;  %v100_v18 = vld [vmem:[%s422_s1 + $0x18] sm:$0xff]  ;;  %s288_s26 = scalar_lea.vmem %s210_s0, 64  ;;  %p293_p1 = scmp.lt.s32.totalorder %s210_s0, %s210_s0 }
   0x9   :  { %252 = vmatpush3.msra.mxu0 %v110_v8  ;;  %v99_v19 = vld [vmem:[%s422_s1 + $0x10] sm:$0xff]  ;;  %v98_v20 = vld [vmem:[%s422_s1 + $0x8] sm:$0xff]  ;;  %v97_v21 = vld [vmem:[%s422_s1] sm:$0xff]  ;;  %p289_p0 = scmp.ne.s32.totalorder %s210_s0, %s288_s26  ;;  %p294_p2 = scmp.lt.s32.totalorder %s288_s26, %s288_s26 }
   0xa   :  { %253 = vmatprep.subr.mxu0 %v311_v6  ;;  %v225_v59 = vld [vmem:[%s423_s2] ss:$0 sm:$0xff] }
   0xb   :  { %254 = vmatpush3.msra.mxu0 %v109_v9  ;;  %p295_p3 = por %p294_p2, %p293_p1 }
   0xc   :  { %255 = vmatprep.subr.mxu0 %v311_v6 }
   0xd   :  { %256 = vmatpush3.msra.mxu0 %v108_v10  ;;  %p296_p4 = pnand %p295_p3, %p289_p0 }
   0xe   :  { %257 = vmatprep.subr.mxu0 %v311_v6 }
   0xf   :  { %258 = vmatpush3.msra.mxu0 %v107_v11 }
  0x10   :  { %259 = vmatprep.subr.mxu0 %v311_v6 }
  0x11   :  { %260 = vmatpush3.msra.mxu0 %v106_v12 }
  0x12   :  { %261 = vmatprep.subr.mxu0 %v311_v6 }
  0x13   :  { %262 = vmatpush3.msra.mxu0 %v105_v13 }
  0x14   :  { %263 = vmatprep.subr.mxu0 %v311_v6 }
  0x15   :  { %264 = vmatpush3.msra.mxu0 %v104_v14 }
  0x16   :  { %265 = vmatprep.subr.mxu0 %v311_v6 }
  0x17   :  { %266 = vmatpush3.msra.mxu0 %v103_v15 }
  0x18   :  { %267 = vmatprep.subr.mxu0 %v311_v6 }
  0x19   :  { %268 = vmatpush3.msra.mxu0 %v102_v16 }
  0x1a   :  { %269 = vmatprep.subr.mxu0 %v311_v6 }
  0x1b   :  { %270 = vmatpush3.msra.mxu0 %v101_v17 }
  0x1c   :  { %271 = vmatprep.subr.mxu0 %v311_v6 }
  0x1d   :  { %272 = vmatpush3.msra.mxu0 %v100_v18 }
  0x1e   :  { %273 = vmatprep.subr.mxu0 %v311_v6 }
  0x1f   :  { %274 = vmatpush3.msra.mxu0 %v99_v19 }
  0x20   :  { %275 = vmatprep.subr.mxu0 %v311_v6 }
  0x21   :  { %276 = vmatpush3.msra.mxu0 %v98_v20 }
  0x22   :  { %277 = vmatprep.subr.mxu0 %v311_v6 }
  0x23   :  { %278 = vmatpush3.msra.mxu0 %v97_v21 }
  0x7d   :  { %v29_v24 = vpop.permute.xlu1 %28  ;;  %v23_v25 = vpop.permute.xlu0 %22 }
  0x7e   :  { %vm35_vm1 = vcmp.eq.s32.totalorder %v20_v23, %v29_v24  ;;  %vm33_vm2 = vcmp.eq.s32.totalorder %v20_v23, %v23_v25 }
  0x7f   :  { %v219_v26 = vsel %vm35_vm1, 1.0, %v311_v6  ;;  %v217_v27 = vsel %vm33_vm2, 1.0, %v311_v6 }
  0x80   :  { %v77_v28 = vrot.slane %v219_v26, 4  ;;  %v65_v29 = vrot.slane %v217_v27, 4 }
  0x81   :  { %v32_v30 = vpop.permute.xlu1 %31  ;;  %v26_v31 = vpop.permute.xlu0 %25 }
  0x82   :  { %v78_v32 = vadd.f32 %v219_v26, %v77_v28  ;;  %v66_v33 = vadd.f32 %v217_v27, %v65_v29  ;;  %vm36_vm3 = vcmp.eq.s32.totalorder %v20_v23, %v32_v30  ;;  %vm34_vm4 = vcmp.eq.s32.totalorder %v20_v23, %v26_v31 }
  0x83   :  { %v220_v34 = vsel %vm36_vm3, 1.0, %v311_v6  ;;  %v218_v35 = vsel %vm34_vm4, 1.0, %v311_v6 }
  0x84   :  { %v79_v36 = vrot.slane %v78_v32, 2  ;;  %v67_v37 = vrot.slane %v66_v33, 2  ;;  %v83_v38 = vrot.slane %v220_v34, 4  ;;  %v71_v39 = vrot.slane %v218_v35, 4 }
  0x86   :  { %v68_v40 = vadd.f32 %v67_v37, %v66_v33  ;;  %v84_v41 = vadd.f32 %v220_v34, %v83_v38  ;;  %v72_v42 = vadd.f32 %v218_v35, %v71_v39  ;;  %v80_v43 = vadd.f32 %v79_v36, %v78_v32 }
  0x88   :  { %v85_v44 = vrot.slane %v84_v41, 2  ;;  %v73_v45 = vrot.slane %v72_v42, 2  ;;  %v69_v46 = vrot.slane %v68_v40, 1  ;;  %v81_v49 = vrot.slane %v80_v43, 1 }
  0x8a   :  { %v86_v47 = vadd.f32 %v85_v44, %v84_v41  ;;  %v74_v48 = vadd.f32 %v73_v45, %v72_v42  ;;  %v70_v52 = vadd.f32 %v69_v46, %v68_v40  ;;  %v82_v54 = vadd.f32 %v81_v49, %v80_v43 }
  0x8c   :  { %v87_v50 = vrot.slane %v86_v47, 1  ;;  %v75_v51 = vrot.slane %v74_v48, 1 }
  0x8e   :  { %v76_v53 = vadd.f32 %v75_v51, %v74_v48  ;;  %v88_v55 = vadd.f32 %v87_v50, %v86_v47 }
  0x90   :  { %v125_v56 = vsel %vm124_vm5, %v76_v53, %v70_v52 }
  0x91   :  { %v127_v57 = vsel %vm126_vm6, %v82_v54, %v125_v56 }
  0x92   :  { %v129_v58 = vsel %vm128_vm7, %v88_v55, %v127_v57 }
  0x93   :  { %280 = vmatmul.mubr.f32.vlgmr.msra.gmra.mxu0 %v129_v58 }
 0x153   :  { %v197_v60 = vpop.f32.mrf.mxu0 }
 0x154   :  { %v198_v61 = vadd.f32 %v225_v59, %v197_v60 }
 0x155   :  { %v281_v62 = vpop.f32.mrf.mxu0 }
 0x156   :  { %202 = vst.msk [vmem:[#allocation2] sm:$0xf] %vm201_vm8, %v198_v61 }
 0x157   :  { %299 = shalt.err (!%p296_p4)
}
 0x158   :  { %212 = dma.vmem_to_hbm [thread:$0]  %s210_s0, 64, %s424_s3, [#allocation3]  }
 0x159   :  { %308 = dma.done.wait [#allocation3], 64  }
 0x15a   :  { %309 = vsyncadd [#allocation3], 4294967232 }
 0x15b   :  { %216 = vsyncpa [#allocation3], 1 }

</bundles_post_ra>
